<compile_context>
chip_gen: v7x
topology: tpu7x:2x2x1
jax: 0.10.0
libtpu: 0.0.40
codegen_flags: <defaults>
</compile_context>

<pallas_src>
import functools

import jax
import jax.numpy as jnp
from jax.experimental import pallas as pl
from jax.experimental.pallas import tpu as pltpu


def _round_up(x, m):
    return ((x + m - 1) // m) * m


def _din_attention_kernel(weight_normalization, mm_dtype,
                          q_ref,      # VMEM [B_BLK, 1, E]  f32
                          k_ref,      # VMEM [B_BLK, S, E]  f32
                          klen_ref,   # VMEM [B_BLK, 1]     i32
                          wq_ref,     # VMEM [E, H1]   (Wa + Wc)
                          wkd_ref,    # VMEM [2E, H1]  ([Wb - Wc ; Wd])
                          b1_ref,     # VMEM [1, H1]
                          w2_ref,     # VMEM [H1, H2]
                          b2_ref,     # VMEM [1, H2]
                          w3r_ref,    # VMEM [1, H2]   (w3^T)
                          b3_ref,     # VMEM [1, 1]
                          out_ref):   # VMEM [B_BLK, E]
    blk, seq, emb = k_ref.shape
    rows = blk * seq
    h1n = wq_ref.shape[1]
    h2n = w2_ref.shape[1]

    def mm(a, b):
        return jnp.dot(a.astype(mm_dtype), b.astype(mm_dtype),
                       preferred_element_type=jnp.float32)

    keys = k_ref[...]                                         # [B, S, E]
    q = q_ref[...]                                            # [B, 1, E]

    # ---- Layer 1: concat folded + query term hoisted out of seq dim ------
    # cat([q,k,q-k,q*k]) @ W1 == q@(Wa+Wc) + [k | q*k] @ [[Wb-Wc];[Wd]]
    q1 = mm(q[:, 0, :], wq_ref[...]) + b1_ref[...]            # [B, H1]

    qk = q * keys                                             # [B, S, E] (broadcast mul)
    lhs = jnp.concatenate([keys, qk], axis=-1)                # [B, S, 2E]
    kterm = mm(lhs.reshape(rows, 2 * emb), wkd_ref[...])      # [B*S, H1] single MXU pass

    pre1 = kterm.reshape(blk, seq, h1n) + q1[:, None, :]      # [B, S, H1]
    h1 = jax.nn.sigmoid(pre1)                                 # f32 sigmoid (EUP)

    # ---- Layer 2 ----------------------------------------------------------
    h2 = jax.nn.sigmoid(mm(h1.reshape(rows, h1n), w2_ref[...]) + b2_ref[...])
    h2 = h2.reshape(blk, seq, h2n)                            # [B, S, H2]

    # ---- Score head (Linear H2 -> 1) as a lane reduce, not an N=1 matmul --
    score = jnp.sum(h2 * w3r_ref[...], axis=-1, keepdims=True) + b3_ref[...]  # [B,S,1]

    # keys_mask: True where position < keys_length ("valid" positions).
    klen = klen_ref[...][:, :, None]                          # [B, 1, 1] i32
    pos = jax.lax.broadcasted_iota(jnp.int32, (blk, seq, 1), 1)
    keys_mask = pos < klen                                    # [B, S, 1] bool

    if weight_normalization:
        score = jnp.where(keys_mask, jnp.float32(-1e-07), score)
        score = jax.nn.softmax(score, axis=1)
    else:
        # masked_fill(score, keys_mask, 0) -- fills where mask is True.
        score = jnp.where(keys_mask, jnp.float32(0.0), score)

    # Pool over S: sum_s score[b,s] * keys[b,s,:]  -> [B, E]
    out_ref[...] = jnp.sum(score * keys, axis=1).astype(out_ref.dtype)


def _choose_block_batch(btz, seq, target_rows=2048, max_blk=1024):
    """Pick B_BLK so B_BLK*S ~ target_rows, multiple of 8, and (for v7x
    megacore) at least 2 grid blocks when the batch is big enough."""
    blk = max(1, target_rows // max(seq, 1))
    blk = min(max(8, _round_up(blk, 8)), max_blk)
    blk = min(blk, _round_up(btz, 8))          # never pad past next sublane multiple
    if btz >= 16 and pl.cdiv(btz, blk) < 2:    # keep >=2 parallel blocks (2 TCs on v7x)
        blk = _round_up(pl.cdiv(btz, 2), 8)
    return blk


def attention_sequence_pooling(query, keys, keys_length, params,
                               weight_normalization=False,
                               block_batch=None,
                               use_bf16_matmul=False):
    """Pallas implementation of AttentionSequencePoolingLayer.forward
    (return_score=False path)."""
    btz, seq, emb = keys.shape
    w1, b1 = params["w1"], params["b1"]          # [4E,H1], [1,H1]
    w2, b2 = params["w2"], params["b2"]          # [H1,H2], [1,H2]
    w3, b3 = params["w3"], params["b3"]          # [H2,1],  [1,1]
    h1 = w1.shape[1]
    h2 = w2.shape[1]

    # Fold the concat into Linear #1 (see kernel comment).
    wa = w1[0 * emb:1 * emb]
    wb = w1[1 * emb:2 * emb]
    wc = w1[2 * emb:3 * emb]
    wd = w1[3 * emb:4 * emb]
    wq_fold = wa + wc                                       # [E, H1]  (query term)
    wkd_fold = jnp.concatenate([wb - wc, wd], axis=0)       # [2E, H1] (fused key term)
    w3_row = w3.T                                           # [1, H2]  (lane-reduce head)

    if block_batch is None:
        block_batch = _choose_block_batch(btz, seq)
    block_batch = max(8, _round_up(block_batch, 8))

    # Pad batch to a multiple of the block (padded rows are discarded).
    bp = _round_up(btz, block_batch)
    pad = bp - btz
    if pad:
        query = jnp.pad(query, ((0, pad), (0, 0), (0, 0)))
        keys = jnp.pad(keys, ((0, pad), (0, 0), (0, 0)))
        keys_length = jnp.pad(keys_length, ((0, pad), (0, 0)))
    keys_length = keys_length.astype(jnp.int32)

    mm_dtype = jnp.bfloat16 if use_bf16_matmul else jnp.float32
    kernel = functools.partial(_din_attention_kernel,
                               weight_normalization, mm_dtype)

    n_blocks = bp // block_batch
    grid_spec = pltpu.PrefetchScalarGridSpec(
        num_scalar_prefetch=0,
        grid=(n_blocks,),
        in_specs=[
            pl.BlockSpec((block_batch, 1, emb), lambda i: (i, 0, 0)),    # query
            pl.BlockSpec((block_batch, seq, emb), lambda i: (i, 0, 0)),  # keys
            pl.BlockSpec((block_batch, 1), lambda i: (i, 0)),            # keys_length
            pl.BlockSpec((emb, h1), lambda i: (0, 0)),                   # Wa+Wc
            pl.BlockSpec((2 * emb, h1), lambda i: (0, 0)),               # [Wb-Wc;Wd]
            pl.BlockSpec((1, h1), lambda i: (0, 0)),                     # b1
            pl.BlockSpec((h1, h2), lambda i: (0, 0)),                    # w2
            pl.BlockSpec((1, h2), lambda i: (0, 0)),                     # b2
            pl.BlockSpec((1, h2), lambda i: (0, 0)),                     # w3^T
            pl.BlockSpec((1, 1), lambda i: (0, 0)),                      # b3
        ],
        out_specs=pl.BlockSpec((block_batch, emb), lambda i: (i, 0)),
    )

    out2d = pl.pallas_call(
        kernel,
        grid_spec=grid_spec,
        out_shape=jax.ShapeDtypeStruct((bp, emb), keys.dtype),
        compiler_params=pltpu.CompilerParams(
            dimension_semantics=("parallel",),
            # 48 MiB scoped VMEM: plenty for these blocks, safe on v7x's 64 MiB
            # physical VMEM as well as v5e/v6e's 128 MiB.
            vmem_limit_bytes=48 * 1024 * 1024),
    )(query, keys, keys_length, wq_fold, wkd_fold, b1, w2, b2, w3_row, b3)

    return out2d[:btz].reshape(btz, 1, emb)


def ref_forward(query, keys, keys_length, params, weight_normalization=False):
    """Pure-JAX reference mirroring the PyTorch forward (return_score=False)."""
    btz, seq, emb = keys.shape
    queries = jnp.broadcast_to(query, (btz, seq, emb))
    x = jnp.concatenate([queries, keys, queries - keys, queries * keys], axis=-1)
    h = jax.nn.sigmoid(x @ params["w1"] + params["b1"][0])
    h = jax.nn.sigmoid(h @ params["w2"] + params["b2"][0])
    score = h @ params["w3"] + params["b3"][0]             # [B, S, 1]
    score = jnp.swapaxes(score, 1, 2)                      # [B, 1, S]
    keys_mask = (jnp.arange(seq)[None, :] < keys_length)[:, None, :]  # [B,1,S]
    if weight_normalization:
        score = jnp.where(keys_mask, -1e-07, score)
        score = jax.nn.softmax(score, axis=-1)
    else:
        score = jnp.where(keys_mask, 0.0, score)
    return jnp.matmul(score, keys)                         # [B, 1, E]


def init_params(key, emb_size, att_hidden_units=(80, 40), init_std=1e-4):
    din = 4 * emb_size
    h1, h2 = att_hidden_units
    ks = jax.random.split(key, 6)
    return {
        # DNN linear weights: normal(0, init_std), matching nn.init.normal_
        "w1": init_std * jax.random.normal(ks[0], (din, h1), jnp.float32),
        "b1": 0.01 * jax.random.normal(ks[1], (1, h1), jnp.float32),
        "w2": init_std * jax.random.normal(ks[2], (h1, h2), jnp.float32),
        "b2": 0.01 * jax.random.normal(ks[3], (1, h2), jnp.float32),
        # dense (score) layer: synthetic init
        "w3": 0.05 * jax.random.normal(ks[4], (h2, 1), jnp.float32),
        "b3": 0.01 * jax.random.normal(ks[5], (1, 1), jnp.float32),
    }


if __name__ == "__main__":
    key = jax.random.PRNGKey(0)
    k_q, k_k, k_len, k_p = jax.random.split(key, 4)

    btz, seq_len, emb_size = 2, 8, 4        # embedding_dim=4 (module default)

    query = jax.random.normal(k_q, (btz, 1, emb_size), jnp.float32)
    keys = jax.random.normal(k_k, (btz, seq_len, emb_size), jnp.float32)
    keys_length = jax.random.randint(k_len, (btz, 1), 1, seq_len + 1, jnp.int32)

    params = init_params(k_p, emb_size, att_hidden_units=(80, 40))

    # default path (weight_normalization=False), f32 matmuls
    out = attention_sequence_pooling(query, keys, keys_length, params,
                                     weight_normalization=False)
    out = jax.block_until_ready(out)
    expected = ref_forward(query, keys, keys_length, params,
                           weight_normalization=False)
    assert out.shape == (btz, 1, emb_size)
    assert jnp.allclose(out, expected, atol=1e-5, rtol=1e-5), (out, expected)

    # weight_normalization=True path
    out_wn = attention_sequence_pooling(query, keys, keys_length, params,
                                        weight_normalization=True)
    out_wn = jax.block_until_ready(out_wn)
    expected_wn = ref_forward(query, keys, keys_length, params,
                              weight_normalization=True)
    assert jnp.allclose(out_wn, expected_wn, atol=1e-5, rtol=1e-5), (
        out_wn, expected_wn)

    # bf16 matmul-input path (production default for v6e/v7x) -- looser check.
    out_bf = attention_sequence_pooling(query, keys, keys_length, params,
                                        weight_normalization=False,
                                        use_bf16_matmul=True)
    out_bf = jax.block_until_ready(out_bf)
    assert out_bf.shape == (btz, 1, emb_size)
    assert bool(jnp.all(jnp.isfinite(out_bf)))
    assert float(jnp.max(jnp.abs(out_bf - expected))) < 5e-2

    print("KERNEL_OK")
</pallas_src>

<mosaic_0001>
module attributes {stable_mosaic.version = 11 : i64} {
  func.func @_din_attention_kernel(%arg0: i32, %arg1: memref<8x1x4xf32, #tpu.memory_space<vmem>>, %arg2: memref<8x8x4xf32, #tpu.memory_space<vmem>>, %arg3: memref<8x1xi32, #tpu.memory_space<vmem>>, %arg4: memref<4x80xf32, #tpu.memory_space<vmem>>, %arg5: memref<8x80xf32, #tpu.memory_space<vmem>>, %arg6: memref<1x80xf32, #tpu.memory_space<vmem>>, %arg7: memref<80x40xf32, #tpu.memory_space<vmem>>, %arg8: memref<1x40xf32, #tpu.memory_space<vmem>>, %arg9: memref<1x40xf32, #tpu.memory_space<vmem>>, %arg10: memref<1x1xf32, #tpu.memory_space<vmem>>, %arg11: memref<8x4xf32, #tpu.memory_space<vmem>>) attributes {dimension_semantics = [#tpu.dimension_semantics<parallel>], iteration_bounds = array<i64: 1>, scalar_prefetch = 0 : i64, scratch_operands = 0 : i64, tpu.core_type = #tpu.core_type<tc>, window_params = [{transform_indices = @transform_0, window_bounds = array<i64: 8, 1, 4>}, {transform_indices = @transform_1, window_bounds = array<i64: 8, 8, 4>}, {transform_indices = @transform_2, window_bounds = array<i64: 8, 1>}, {pipeline_mode = #tpu.pipeline_mode<synchronous>, transform_indices = @transform_3, window_bounds = array<i64: 4, 80>}, {pipeline_mode = #tpu.pipeline_mode<synchronous>, transform_indices = @transform_4, window_bounds = array<i64: 8, 80>}, {pipeline_mode = #tpu.pipeline_mode<synchronous>, transform_indices = @transform_5, window_bounds = array<i64: 1, 80>}, {pipeline_mode = #tpu.pipeline_mode<synchronous>, transform_indices = @transform_6, window_bounds = array<i64: 80, 40>}, {pipeline_mode = #tpu.pipeline_mode<synchronous>, transform_indices = @transform_7, window_bounds = array<i64: 1, 40>}, {pipeline_mode = #tpu.pipeline_mode<synchronous>, transform_indices = @transform_8, window_bounds = array<i64: 1, 40>}, {pipeline_mode = #tpu.pipeline_mode<synchronous>, transform_indices = @transform_9, window_bounds = array<i64: 1, 1>}, {transform_indices = @transform_10, window_bounds = array<i64: 8, 4>}]} {
    %c0 = arith.constant 0 : index
    %c0_0 = arith.constant 0 : index
    %c0_1 = arith.constant 0 : index
    %0 = vector.load %arg2[%c0, %c0_0, %c0_1] : memref<8x8x4xf32, #tpu.memory_space<vmem>>, vector<8x8x4xf32>
    %c0_2 = arith.constant 0 : index
    %c0_3 = arith.constant 0 : index
    %c0_4 = arith.constant 0 : index
    %1 = vector.load %arg1[%c0_2, %c0_3, %c0_4] : memref<8x1x4xf32, #tpu.memory_space<vmem>>, vector<8x1x4xf32>
    %2 = vector.shape_cast %1 : vector<8x1x4xf32> to vector<8x4xf32>
    %c0_5 = arith.constant 0 : index
    %c0_6 = arith.constant 0 : index
    %3 = vector.load %arg4[%c0_5, %c0_6] : memref<4x80xf32, #tpu.memory_space<vmem>>, vector<4x80xf32>
    %cst = arith.constant dense<0.000000e+00> : vector<8x80xf32>
    %4 = tpu.matmul %2, %3, %cst {dimension_numbers = #tpu.dot_dimension_numbers<[1], [0], [0], [1], [0, 0, 1, 1], [], []>} : vector<8x4xf32>, vector<4x80xf32>, vector<8x80xf32> -> vector<8x80xf32>
    %c0_7 = arith.constant 0 : index
    %c0_8 = arith.constant 0 : index
    %5 = vector.load %arg6[%c0_7, %c0_8] : memref<1x80xf32, #tpu.memory_space<vmem>>, vector<1x80xf32>
    %6 = vector.broadcast %5 : vector<1x80xf32> to vector<8x80xf32>
    %7 = arith.addf %4, %6 : vector<8x80xf32>
    %8 = vector.broadcast %1 : vector<8x1x4xf32> to vector<8x8x4xf32>
    %9 = arith.mulf %8, %0 : vector<8x8x4xf32>
    %10 = tpu.concatenate %0, %9 in 2 : vector<8x8x4xf32>, vector<8x8x4xf32> -> vector<8x8x8xf32>
    %11 = vector.shape_cast %10 : vector<8x8x8xf32> to vector<64x8xf32>
    %c0_9 = arith.constant 0 : index
    %c0_10 = arith.constant 0 : index
    %12 = vector.load %arg5[%c0_9, %c0_10] : memref<8x80xf32, #tpu.memory_space<vmem>>, vector<8x80xf32>
    %cst_11 = arith.constant dense<0.000000e+00> : vector<64x80xf32>
    %13 = tpu.matmul %11, %12, %cst_11 {dimension_numbers = #tpu.dot_dimension_numbers<[1], [0], [0], [1], [0, 0, 1, 1], [], []>} : vector<64x8xf32>, vector<8x80xf32>, vector<64x80xf32> -> vector<64x80xf32>
    %14 = vector.shape_cast %13 : vector<64x80xf32> to vector<8x8x80xf32>
    %15 = vector.shape_cast %7 : vector<8x80xf32> to vector<8x1x80xf32>
    %16 = vector.broadcast %15 : vector<8x1x80xf32> to vector<8x8x80xf32>
    %17 = arith.addf %14, %16 : vector<8x8x80xf32>
    %18 = arith.negf %17 : vector<8x8x80xf32>
    %19 = math.exp %18 : vector<8x8x80xf32>
    %cst_12 = arith.constant 1.000000e+00 : f32
    %20 = vector.broadcast %cst_12 : f32 to vector<8x8x80xf32>
    %21 = arith.addf %20, %19 : vector<8x8x80xf32>
    %22 = arith.divf %20, %21 : vector<8x8x80xf32>
    %23 = vector.shape_cast %22 : vector<8x8x80xf32> to vector<64x80xf32>
    %c0_13 = arith.constant 0 : index
    %c0_14 = arith.constant 0 : index
    %24 = vector.load %arg7[%c0_13, %c0_14] : memref<80x40xf32, #tpu.memory_space<vmem>>, vector<80x40xf32>
    %cst_15 = arith.constant dense<0.000000e+00> : vector<64x40xf32>
    %25 = tpu.matmul %23, %24, %cst_15 {dimension_numbers = #tpu.dot_dimension_numbers<[1], [0], [0], [1], [0, 0, 1, 1], [], []>} : vector<64x80xf32>, vector<80x40xf32>, vector<64x40xf32> -> vector<64x40xf32>
    %c0_16 = arith.constant 0 : index
    %c0_17 = arith.constant 0 : index
    %26 = vector.load %arg8[%c0_16, %c0_17] : memref<1x40xf32, #tpu.memory_space<vmem>>, vector<1x40xf32>
    %27 = vector.broadcast %26 : vector<1x40xf32> to vector<64x40xf32>
    %28 = arith.addf %25, %27 : vector<64x40xf32>
    %29 = arith.negf %28 : vector<64x40xf32>
    %30 = math.exp %29 : vector<64x40xf32>
    %cst_18 = arith.constant 1.000000e+00 : f32
    %31 = vector.broadcast %cst_18 : f32 to vector<64x40xf32>
    %32 = arith.addf %31, %30 : vector<64x40xf32>
    %33 = arith.divf %31, %32 : vector<64x40xf32>
    %34 = vector.shape_cast %33 : vector<64x40xf32> to vector<8x8x40xf32>
    %c0_19 = arith.constant 0 : index
    %c0_20 = arith.constant 0 : index
    %35 = vector.load %arg9[%c0_19, %c0_20] : memref<1x40xf32, #tpu.memory_space<vmem>>, vector<1x40xf32>
    %36 = vector.shape_cast %35 : vector<1x40xf32> to vector<1x1x40xf32>
    %37 = vector.broadcast %36 : vector<1x1x40xf32> to vector<8x8x40xf32>
    %38 = arith.mulf %34, %37 : vector<8x8x40xf32>
    %cst_21 = arith.constant dense<0.000000e+00> : vector<8x8xf32>
    %39 = vector.multi_reduction <add>, %38, %cst_21 [2] : vector<8x8x40xf32> to vector<8x8xf32>
    %40 = vector.shape_cast %39 : vector<8x8xf32> to vector<8x8x1xf32>
    %c0_22 = arith.constant 0 : index
    %c0_23 = arith.constant 0 : index
    %41 = vector.load %arg10[%c0_22, %c0_23] : memref<1x1xf32, #tpu.memory_space<vmem>>, vector<1x1xf32>
    %42 = vector.shape_cast %41 : vector<1x1xf32> to vector<1x1x1xf32>
    %43 = vector.broadcast %42 : vector<1x1x1xf32> to vector<8x8x1xf32>
    %44 = arith.addf %40, %43 : vector<8x8x1xf32>
    %c0_24 = arith.constant 0 : index
    %c0_25 = arith.constant 0 : index
    %45 = vector.load %arg3[%c0_24, %c0_25] : memref<8x1xi32, #tpu.memory_space<vmem>>, vector<8x1xi32>
    %46 = vector.shape_cast %45 : vector<8x1xi32> to vector<8x1x1xi32>
    %47 = tpu.iota {dimensions = array<i32: 1>} : vector<8x8x1xi32>
    %48 = vector.broadcast %46 : vector<8x1x1xi32> to vector<8x8x1xi32>
    %49 = arith.cmpi slt, %47, %48 : vector<8x8x1xi32>
    %cst_26 = arith.constant 0.000000e+00 : f32
    %50 = vector.broadcast %cst_26 : f32 to vector<8x8x1xf32>
    %51 = arith.select %49, %50, %44 : vector<8x8x1xi1>, vector<8x8x1xf32>
    %52 = vector.broadcast %51 : vector<8x8x1xf32> to vector<8x8x4xf32>
    %53 = arith.mulf %52, %0 : vector<8x8x4xf32>
    %cst_27 = arith.constant dense<0.000000e+00> : vector<8x4xf32>
    %54 = vector.multi_reduction <add>, %53, %cst_27 [1] : vector<8x8x4xf32> to vector<8x4xf32>
    %c0_28 = arith.constant 0 : index
    %c0_29 = arith.constant 0 : index
    %55 = vector.load %arg11[%c0_28, %c0_29] : memref<8x4xf32, #tpu.memory_space<vmem>>, vector<8x4xf32>
    tpu.vector_store %arg11[%c0_28, %c0_29], %54 {strides = array<i32>} : memref<8x4xf32, #tpu.memory_space<vmem>>, vector<8x4xf32>,
    return
  }
  func.func @transform_0(%arg0: i32) -> (i32, i32, i32) {
    %c0_i32 = arith.constant 0 : i32
    %c0_i32_0 = arith.constant 0 : i32
    %c0_i32_1 = arith.constant 0 : i32
    return %arg0, %c0_i32, %c0_i32_0 : i32, i32, i32
  }
  func.func @transform_1(%arg0: i32) -> (i32, i32, i32) {
    %c0_i32 = arith.constant 0 : i32
    %c0_i32_0 = arith.constant 0 : i32
    %c0_i32_1 = arith.constant 0 : i32
    return %arg0, %c0_i32, %c0_i32_0 : i32, i32, i32
  }
  func.func @transform_2(%arg0: i32) -> (i32, i32) {
    %c0_i32 = arith.constant 0 : i32
    %c0_i32_0 = arith.constant 0 : i32
    return %arg0, %c0_i32 : i32, i32
  }
  func.func @transform_3(%arg0: i32) -> (i32, i32) {
    %c0_i32 = arith.constant 0 : i32
    %c0_i32_0 = arith.constant 0 : i32
    %c0_i32_1 = arith.constant 0 : i32
    return %c0_i32, %c0_i32_0 : i32, i32
  }
  func.func @transform_4(%arg0: i32) -> (i32, i32) {
    %c0_i32 = arith.constant 0 : i32
    %c0_i32_0 = arith.constant 0 : i32
    %c0_i32_1 = arith.constant 0 : i32
    return %c0_i32, %c0_i32_0 : i32, i32
  }
  func.func @transform_5(%arg0: i32) -> (i32, i32) {
    %c0_i32 = arith.constant 0 : i32
    %c0_i32_0 = arith.constant 0 : i32
    %c0_i32_1 = arith.constant 0 : i32
    return %c0_i32, %c0_i32_0 : i32, i32
  }
  func.func @transform_6(%arg0: i32) -> (i32, i32) {
    %c0_i32 = arith.constant 0 : i32
    %c0_i32_0 = arith.constant 0 : i32
    %c0_i32_1 = arith.constant 0 : i32
    return %c0_i32, %c0_i32_0 : i32, i32
  }
  func.func @transform_7(%arg0: i32) -> (i32, i32) {
    %c0_i32 = arith.constant 0 : i32
    %c0_i32_0 = arith.constant 0 : i32
    %c0_i32_1 = arith.constant 0 : i32
    return %c0_i32, %c0_i32_0 : i32, i32
  }
  func.func @transform_8(%arg0: i32) -> (i32, i32) {
    %c0_i32 = arith.constant 0 : i32
    %c0_i32_0 = arith.constant 0 : i32
    %c0_i32_1 = arith.constant 0 : i32
    return %c0_i32, %c0_i32_0 : i32, i32
  }
  func.func @transform_9(%arg0: i32) -> (i32, i32) {
    %c0_i32 = arith.constant 0 : i32
    %c0_i32_0 = arith.constant 0 : i32
    %c0_i32_1 = arith.constant 0 : i32
    return %c0_i32, %c0_i32_0 : i32, i32
  }
  func.func @transform_10(%arg0: i32) -> (i32, i32) {
    %c0_i32 = arith.constant 0 : i32
    %c0_i32_0 = arith.constant 0 : i32
    return %arg0, %c0_i32 : i32, i32
  }
}

</mosaic_0001>

<bundles_post_ra>
// kernel: tpu_custom_call.1
= control target key start
LH: loop header
LB: loop body
LE: loop exit
PB: predicated region body
PF: predicated region fallthrough
CT: control target
= control target key end

     0   :  { %v76_v0 = vlaneseq  ;;  %v1262_v3 = vmov 1966171168   ;;  %v1263_v5 = vmov 0.0   ;;  %vm1264_vm0 = vmmov 0   ;;  %s1265_s19 = smov 4   ;;  %s1564_s0 = inlined_call_operand.vmem [shape: f32[8,1,4], index: 0, kind: input, shape index: {}]   ;;  %s1565_s1 = inlined_call_operand.vmem [shape: f32[8,8,4], index: 1, kind: input, shape index: {}]   ;;  %s1566_s3 = inlined_call_operand.vmem [shape: f32[4,80], index: 3, kind: input, shape index: {}]   ;;  %s1567_s4 = inlined_call_operand.vmem [shape: f32[8,80], index: 4, kind: input, shape index: {}]   ;;  %s1568_s6 = inlined_call_operand.vmem [shape: f32[80,40], index: 6, kind: input, shape index: {}]   ;;  %s1569_s5 = inlined_call_operand.vmem [shape: f32[1,80], index: 5, kind: input, shape index: {}]   ;;  %s1570_s9 = inlined_call_operand.<no memory space> [shape: f32[1,1], index: 9, kind: input, shape index: {}]   ;;  %s1571_s7 = inlined_call_operand.vmem [shape: f32[1,40], index: 7, kind: input, shape index: {}]   ;;  %s1572_s8 = inlined_call_operand.vmem [shape: f32[1,40], index: 8, kind: input, shape index: {}]   ;;  %s1573_s2 = inlined_call_operand.vmem [shape: s32[8,1], index: 2, kind: input, shape index: {}]   ;;  %s1574_s10 = inlined_call_operand.vmem [shape: f32[8,4], index: 10, kind: output, shape index: {}]  }
   0x1   :  { %v45_v1 = vld [vmem:[%s1564_s0] sm:$0x1]  ;;  %v46_v2 = vld [vmem:[%s1564_s0 + $0x1] sm:$0x1]  ;;  %v74_v4 = vunpack.c.l.s4 %v1262_v3  ;;  %1109 = vmatprep.subr.mxu0 %v1263_v5  ;;  %v47_v7 = vld [vmem:[%s1564_s0 + $0x2] sm:$0x1]  ;;  %1111 = vmatprep.mubr.msk.f32.mxu0 %vm1264_vm0, %v1263_v5 }
   0x2   :  { %v1328_v6 = vshrl.u32 %v76_v0, 7  ;;  %v48_v8 = vld [vmem:[%s1564_s0 + $0x3] sm:$0x1]  ;;  %v69_v10 = vcombine.low %v45_v1, %v46_v2  ;;  %v49_v13 = vld [vmem:[%s1564_s0 + $0x4] sm:$0x1]  ;;  %vm121_vm1 = vcmask 1043456  }
   0x3   :  { %v75_v9 = vunpack.c.0.s8 %v74_v4  ;;  %v70_v11 = vcombine.low %v47_v7, %v48_v8  ;;  %v50_v14 = vld [vmem:[%s1564_s0 + $0x5] sm:$0x1]  ;;  %v1356_v17 = vld [vmem:[%s1565_s1 + $0x10] sm:$0xff]  ;;  %v1361_v18 = vld [vmem:[%s1565_s1 + $0x8] sm:$0xff]  ;;  %vm118_vm2 = vcmask 31744   ;;  %vm284_vm3 = vcmask 64512  }
   0x4   :  { %v1337_v12 = vsub.s32 0, %v1328_v6  ;;  %v1348_v15 = vld [vmem:[%s1565_s1] sm:$0xff]  ;;  %v71_v19 = vcombine.low %v49_v13, %v50_v14  ;;  %v1369_v23 = vld [vmem:[%s1565_s1 + $0x18] sm:$0xff]  ;;  %v1401_v41 = vld [vmem:[%s1565_s1 + $0x28] sm:$0xff]  ;;  %vm577_vm4 = vcmask 654336   ;;  %vm770_vm5 = vcmask 326656  }
   0x5   :  { %v1351_v16 = vsub.s32 %v75_v9, %v1328_v6  ;;  %v53_v25 = vld [vmem:[%s1566_s3] sm:$0xf]  ;;  %v51_v35 = vld [vmem:[%s1564_s0 + $0x6] sm:$0x1]  ;;  %v52_v36 = vld [vmem:[%s1564_s0 + $0x7] sm:$0x1] }
   0x6   :  { %v198_v20 = vrot.slane %v45_v1, %v1337_v12  ;;  %v206_v21 = vrot.slane %v47_v7, %v1337_v12  ;;  %v202_v22 = vrot.slane %v46_v2, %v1337_v12  ;;  %v210_v24 = vrot.slane %v48_v8, %v1337_v12  ;;  %v283_v26 = vld [vmem:[%s1567_s4] sm:$0xff]  ;;  %1110 = vmatpush3.msk.msra.mxu0 %vm121_vm1, %v53_v25  ;;  %v1412_v49 = vld [vmem:[%s1565_s1 + $0x30] sm:$0xff]  ;;  %v1417_v50 = vld [vmem:[%s1565_s1 + $0x38] sm:$0xff] }
   0x7   :  { %v79_v27 = vrot.slane %v69_v10, %v1351_v16  ;;  %v86_v28 = vrot.slane %v70_v11, %v1351_v16  ;;  %1114 = vmatprep.subr.mxu1 %v283_v26  ;;  %v214_v33 = vrot.slane %v49_v13, %v1337_v12  ;;  %v93_v34 = vrot.slane %v71_v19, %v1351_v16  ;;  %v1395_v38 = vld [vmem:[%s1565_s1 + $0x20] sm:$0xff]  ;;  %v561_v9 = vld [vmem:[%s1568_s6 + $0x8] sm:$0xff]  ;;  %v562_v11 = vld [vmem:[%s1568_s6 + $0x10] sm:$0xff] }
   0x8   :  { %v235_v29 = vmul.f32 %v198_v20, %v1348_v15  ;;  %v237_v30 = vmul.f32 %v206_v21, %v1356_v17  ;;  %v236_v31 = vmul.f32 %v202_v22, %v1361_v18  ;;  %v238_v32 = vmul.f32 %v210_v24, %v1369_v23  ;;  %1115 = vmatpush3.msra.mxu1 %v283_v26  ;;  %v560_v8 = vld [vmem:[%s1568_s6] sm:$0xff]  ;;  %v563_v13 = vld [vmem:[%s1568_s6 + $0x18] sm:$0xff]  ;;  %v565_v21 = vld [vmem:[%s1568_s6 + $0x28] sm:$0xff] }
   0x9   :  { %v101_v37 = vcombine.low %v79_v27, %v86_v28  ;;  %v218_v39 = vrot.slane %v50_v14, %v1337_v12  ;;  %v72_v40 = vcombine.low %v51_v35, %v52_v36  ;;  %v239_v43 = vmul.f32 %v214_v33, %v1395_v38  ;;  %v564_v20 = vld [vmem:[%s1568_s6 + $0x20] sm:$0xff]  ;;  %v566_v25 = vld [vmem:[%s1568_s6 + $0x30] sm:$0xff]  ;;  %v567_v26 = vld [vmem:[%s1568_s6 + $0x38] sm:$0xff] }
   0xa   :  { %251 = vrot.lane.b32.xlu0 %v235_v29, %s1265_s19  ;;  %255 = vrot.lane.b32.xlu1 %v237_v30, %s1265_s19  ;;  %v222_v44 = vrot.slane %v51_v35, %v1337_v12  ;;  %v226_v45 = vrot.slane %v52_v36, %v1337_v12  ;;  %v1160_v10 = vpack.c.bf16 %v561_v9, %v560_v8  ;;  %v568_v28 = vld [vmem:[%s1568_s6 + $0x40] sm:$0xff]  ;;  %v569_v29 = vld [vmem:[%s1568_s6 + $0x48] sm:$0xff]  ;;  %vm1022_vm14 = vcmask 1041409  }
   0xb   :  { %v100_v42 = vrot.slane %v72_v40, %v1351_v16  ;;  %v240_v46 = vmul.f32 %v218_v39, %v1401_v41  ;;  %v109_v48 = vrot.slane %v101_v37, %v1351_v16  ;;  %v1164_v14 = vpack.c.bf16 %v563_v13, %v562_v11 }
   0xc   :  { %v241_v52 = vmul.f32 %v222_v44, %v1412_v49  ;;  %v242_v53 = vmul.f32 %v226_v45, %v1417_v50  ;;  %1161 = vmatprep.subr.bf16.mxu0 %v1160_v10  ;;  %1180 = vmatprep.subr.bf16.mxu1 %v1160_v10  ;;  %v1168_v24 = vpack.c.bf16 %v565_v21, %v564_v20  ;;  %vm1024_vm15 = vcmask 1042434  }
   0xd   :  { %v102_v47 = vcombine.low %v93_v34, %v100_v42  ;;  %v1172_v27 = vpack.c.bf16 %v567_v26, %v566_v25  ;;  %v1176_v30 = vpack.c.bf16 %v569_v29, %v568_v28  ;;  %vm1026_vm0 = vcmask 1043459  }
   0xe   :  { %253 = vrot.lane.b32.xlu0 %v236_v31, %s1265_s19  ;;  %257 = vrot.lane.b32.xlu1 %v238_v32, %s1265_s19  ;;  %v1042_v31 = vld [vmem:[%s1569_s5] ss:$0 sm:$0xff]  ;;  %vm1028_vm1 = vcmask 1044484  }
   0xf   :  { %v116_v51 = vrot.slane %v102_v47, %v1351_v16 }
  0x11   :  { %v117_v54 = vcombine.low %v109_v48, %v116_v51 }
  0x12   :  { %259 = vrot.lane.b32.xlu0 %v239_v43, %s1265_s19  ;;  %261 = vrot.lane.b32.xlu1 %v240_v46, %s1265_s19 }
  0x13   :  { %1112 = vmatmul.mubr.msk.f32.vlgmr.msra.gmra.mrb[0].mxu0 %vm118_vm2, %v117_v54 }
  0x14   :  { %1163 = vmatpush3.bf16.msra.mxu0 %v1160_v10 }
  0x15   :  { %1165 = vmatprep.subr.bf16.mxu0 %v1164_v14 }
  0x16   :  { %263 = vrot.lane.b32.xlu0 %v241_v52, %s1265_s19  ;;  %265 = vrot.lane.b32.xlu1 %v242_v53, %s1265_s19 }
  0x18   :  { %1167 = vmatpush3.bf16.msra.mxu0 %v1164_v14 }
  0x19   :  { %1169 = vmatprep.subr.bf16.mxu0 %v1168_v24 }
  0x1c   :  { %1171 = vmatpush3.bf16.msra.mxu0 %v1168_v24 }
  0x1d   :  { %1173 = vmatprep.subr.bf16.mxu0 %v1172_v27 }
  0x20   :  { %1175 = vmatpush3.bf16.msra.mxu0 %v1172_v27 }
  0x21   :  { %1177 = vmatprep.subr.bf16.mxu0 %v1176_v30 }
  0x24   :  { %1179 = vmatpush3.bf16.msra.mxu0 %v1176_v30 }
  0x7c   :  { %v252_v55 = vpop.permute.xlu0 %251  ;;  %v256_v56 = vpop.permute.xlu1 %255 }
  0x7d   :  { %v275_v57 = vsel %vm118_vm2, %v1348_v15, %v252_v55  ;;  %v277_v58 = vsel %vm118_vm2, %v1356_v17, %v256_v56 }
  0x7e   :  { %1116 = vmatprep.mubr.msk.f32.mxu1 %vm284_vm3, %v275_v57 }
  0x80   :  { %v254_v59 = vpop.permute.xlu0 %253  ;;  %v258_v60 = vpop.permute.xlu1 %257 }
  0x81   :  { %v276_v61 = vsel %vm118_vm2, %v1361_v18, %v254_v59  ;;  %v278_v62 = vsel %vm118_vm2, %v1369_v23, %v258_v60 }
  0x82   :  { %1117 = vmatmul.mubr.msk.f32.vlgmr.msra.gmra.mrb[0].mxu1 %vm284_vm3, %v276_v61 }
  0x83   :  { %1119 = vmatprep.mubr.msk.f32.mxu1 %vm284_vm3, %v277_v58  ;;  %1185 = vmatpush3.bf16.msra.mxu1 %v1160_v10 }
  0x84   :  { %v260_v63 = vpop.permute.xlu0 %259  ;;  %v262_v0 = vpop.permute.xlu1 %261  ;;  %1181 = vmatprep.subr.bf16.mxu1 %v1164_v14 }
  0x85   :  { %v279_v1 = vsel %vm118_vm2, %v1395_v38, %v260_v63  ;;  %v280_v2 = vsel %vm118_vm2, %v1401_v41, %v262_v0 }
  0x86   :  { %1120 = vmatmul.mubr.msk.f32.gmra.mrb[2].mxu1 %vm284_vm3, %v278_v62 }
  0x87   :  { %1122 = vmatprep.mubr.msk.f32.mxu1 %vm284_vm3, %v279_v1  ;;  %1186 = vmatpush3.bf16.msra.mxu1 %v1164_v14 }
  0x88   :  { %v264_v3 = vpop.permute.xlu0 %263  ;;  %v266_v4 = vpop.permute.xlu1 %265  ;;  %1182 = vmatprep.subr.bf16.mxu1 %v1168_v24 }
  0x89   :  { %v281_v5 = vsel %vm118_vm2, %v1412_v49, %v264_v3  ;;  %v282_v7 = vsel %vm118_vm2, %v1417_v50, %v266_v4 }
  0x8a   :  { %1123 = vmatmul.mubr.msk.f32.gmra.mrb[4].mxu1 %vm284_vm3, %v280_v2 }
  0x8b   :  { %1125 = vmatprep.mubr.msk.f32.mxu1 %vm284_vm3, %v281_v5  ;;  %1187 = vmatpush3.bf16.msra.mxu1 %v1168_v24 }
  0x8c   :  { %1183 = vmatprep.subr.bf16.mxu1 %v1172_v27 }
  0x8e   :  { %1126 = vmatmul.mubr.msk.f32.gmra.mrb[6].mxu1 %vm284_vm3, %v282_v7  ;;  %vm1030_vm3 = vcmask 1045509  }
  0x8f   :  { %1188 = vmatpush3.bf16.msra.mxu1 %v1172_v27 }
  0x90   :  { %1184 = vmatprep.subr.bf16.mxu1 %v1176_v30 }
  0x93   :  { %1189 = vmatpush3.bf16.msra.mxu1 %v1176_v30 }
  0xe6   :  { %v191_v19 = vpop.f32.mrb[0].mxu0 }
  0xe7   :  { %v1113_v22 = vpop.f32.mrb[1].mxu0  ;;  %v192_v32 = vadd.f32 %v1042_v31, %v191_v19 }
  0xe9   :  { %v422_v33 = vrot.slane %v192_v32, %v1351_v16  ;;  %v415_v35 = vcombine.high %v192_v32, %v192_v32 }
  0xeb   :  { %v430_v34 = vcombine.high %v422_v33, %v422_v33  ;;  %v438_v37 = vrot.slane %v422_v33, %v1351_v16  ;;  %v429_v39 = vrot.slane %v415_v35, %v1351_v16 }
  0xed   :  { %v452_v36 = vrot.slane %v430_v34, %v1351_v16  ;;  %v467_v43 = vrot.slane %v438_v37, %v1337_v12  ;;  %v431_v44 = vcombine.high %v429_v39, %v429_v39  ;;  %v460_v46 = vcombine.high %v438_v37, %v438_v37 }
  0xee   :  { %v445_v58 = vrot.slane %v429_v39, %v1351_v16 }
  0xef   :  { %v471_v40 = vrot.slane %v452_v36, %v1337_v12  ;;  %v462_v42 = vcombine.high %v452_v36, %v452_v36  ;;  %v459_v54 = vrot.slane %v431_v44, %v1351_v16  ;;  %v475_v57 = vrot.slane %v460_v46, %v1337_v12 }
  0xf0   :  { %v483_v3 = vrot.slane %v445_v58, %v1337_v12  ;;  %v461_v4 = vcombine.high %v445_v58, %v445_v58 }
  0xf1   :  { %v479_v51 = vrot.slane %v462_v42, %v1337_v12  ;;  %v487_v63 = vrot.slane %v459_v54, %v1337_v12  ;;  %v463_v0 = vcombine.high %v459_v54, %v459_v54  ;;  %v1061_v54 = vld [vmem:[%s1571_s7] ss:$0 sm:$0xff] }
  0xf2   :  { %v491_v14 = vrot.slane %v461_v4, %v1337_v12 }
  0xf3   :  { %v495_v10 = vrot.slane %v463_v0, %v1337_v12 }
 0x155   :  { %v1118_v45 = vpop.f32.mrb[0].mxu1 }
 0x156   :  { %v505_v47 = vadd.f32 %v1118_v45, %v471_v40  ;;  %v375_v48 = vpop.f32.mrb[1].mxu1 }
 0x157   :  { %v504_v52 = vadd.f32 %v467_v43, %v375_v48 }
 0x158   :  { %v1054_v53 = vmul.f32 -1.442695, %v505_v47 }
 0x159   :  { %v1053_v55 = vmul.f32 -1.442695, %v504_v52  ;;  %v1121_v56 = vpop.f32.mrb[2].mxu1 }
 0x15a   :  { %1198 = vpow2.f32 %v1054_v53  ;;  %v507_v59 = vadd.f32 %v1121_v56, %v479_v51  ;;  %v385_v60 = vpop.f32.mrb[3].mxu1  ;;  %v15_v53 = vstv %s1570_s9 }
 0x15b   :  { %1200 = vpow2.f32 %v1053_v55  ;;  %v506_v61 = vadd.f32 %v475_v57, %v385_v60  ;;  %16 = vst [vmem:[#allocation2] sm:$0x1] %v15_v53 }
 0x15c   :  { %v1056_v62 = vmul.f32 -1.442695, %v507_v59 }
 0x15d   :  { %v1055_v1 = vmul.f32 -1.442695, %v506_v61  ;;  %v1124_v2 = vpop.f32.mrb[4].mxu1 }
 0x15e   :  { %1202 = vpow2.f32 %v1056_v62  ;;  %v509_v5 = vadd.f32 %v1124_v2, %v487_v63  ;;  %v395_v7 = vpop.f32.mrb[5].mxu1 }
 0x15f   :  { %1204 = vpow2.f32 %v1055_v1  ;;  %v508_v8 = vadd.f32 %v483_v3, %v395_v7 }
 0x160   :  { %v1058_v9 = vmul.f32 -1.442695, %v509_v5 }
 0x161   :  { %v1057_v11 = vmul.f32 -1.442695, %v508_v8  ;;  %v1127_v13 = vpop.f32.mrb[6].mxu1 }
 0x162   :  { %1206 = vpow2.f32 %v1058_v9  ;;  %v511_v19 = vadd.f32 %v1127_v13, %v495_v10  ;;  %v405_v20 = vpop.f32.mrb[7].mxu1 }
 0x163   :  { %1208 = vpow2.f32 %v1057_v11  ;;  %v510_v21 = vadd.f32 %v491_v14, %v405_v20 }
 0x164   :  { %v1199_v22 = vpop.eup %1198  ;;  %v1060_v24 = vmul.f32 -1.442695, %v511_v19 }
 0x165   :  { %v1201_v25 = vpop.eup %1200  ;;  %v537_v26 = vadd.f32 1.0, %v1199_v22  ;;  %v1059_v27 = vmul.f32 -1.442695, %v510_v21 }
 0x166   :  { %v536_v28 = vadd.f32 1.0, %v1201_v25  ;;  %1210 = vpow2.f32 %v1060_v24 }
 0x167   :  { %1212 = vrcp.f32 %v537_v26 }
 0x168   :  { %v1203_v29 = vpop.eup %1202  ;;  %1214 = vrcp.f32 %v536_v28 }
 0x169   :  { %v1205_v30 = vpop.eup %1204  ;;  %v539_v31 = vadd.f32 1.0, %v1203_v29  ;;  %1216 = vpow2.f32 %v1059_v27 }
 0x16a   :  { %v538_v32 = vadd.f32 1.0, %v1205_v30 }
 0x16c   :  { %v1207_v33 = vpop.eup %1206  ;;  %1218 = vrcp.f32 %v538_v32 }
 0x16d   :  { %v1209_v34 = vpop.eup %1208  ;;  %1220 = vrcp.f32 %v539_v31  ;;  %v541_v35 = vadd.f32 1.0, %v1207_v33 }
 0x16e   :  { %v540_v36 = vadd.f32 1.0, %v1209_v34  ;;  %v1078_v34 = vld [vmem:[%s1572_s8] ss:$0 sm:$0xff] }
 0x170   :  { %v1211_v37 = vpop.eup %1210  ;;  %1222 = vrcp.f32 %v540_v36 }
 0x171   :  { %v1213_v39 = vpop.eup %1212  ;;  %1224 = vrcp.f32 %v541_v35  ;;  %v543_v43 = vadd.f32 1.0, %v1211_v37 }
 0x172   :  { %v1215_v40 = vpop.eup %1214 }
 0x173   :  { %v1217_v42 = vpop.eup %1216  ;;  %1148 = vmatprep.mubr.msk.f32.mxu0 %vm577_vm4, %v1215_v40 }
 0x174   :  { %v542_v44 = vadd.f32 1.0, %v1217_v42  ;;  %1149 = vmatmul.mubr.msk.f32.vlgmr.msra.gmra.mrb[2].mxu0 %vm577_vm4, %v1213_v39 }
 0x176   :  { %v1219_v45 = vpop.eup %1218  ;;  %1226 = vrcp.f32 %v542_v44 }
 0x177   :  { %v1221_v46 = vpop.eup %1220  ;;  %1228 = vrcp.f32 %v543_v43  ;;  %1151 = vmatprep.mubr.msk.f32.mxu0 %vm577_vm4, %v1219_v45 }
 0x178   :  { %1152 = vmatmul.mubr.msk.f32.gmra.mrb[4].mxu0 %vm577_vm4, %v1221_v46 }
 0x17a   :  { %v1223_v47 = vpop.eup %1222 }
 0x17b   :  { %v1225_v48 = vpop.eup %1224  ;;  %1154 = vmatprep.mubr.msk.f32.mxu1 %vm577_vm4, %v1223_v47 }
 0x17c   :  { %1155 = vmatmul.mubr.msk.f32.vlgmr.msra.gmra.mrb[8].mxu1 %vm577_vm4, %v1225_v48 }
 0x180   :  { %v1227_v51 = vpop.eup %1226 }
 0x181   :  { %v1229_v52 = vpop.eup %1228  ;;  %1157 = vmatprep.mubr.msk.f32.mxu1 %vm577_vm4, %v1227_v51 }
 0x182   :  { %1158 = vmatmul.mubr.msk.f32.gmra.mrb[10].mxu1 %vm577_vm4, %v1229_v52  ;;  %vm1032_vm4 = vcmask 1046534  }
 0x247   :  { %v1150_v55 = vpop.f32.mrb[2].mxu0 }
 0x248   :  { %v674_v56 = vadd.f32 %v1150_v55, %v1061_v54  ;;  %v668_v57 = vpop.f32.mrb[3].mxu0 }
 0x249   :  { %v669_v58 = vadd.f32 %v1061_v54, %v668_v57 }
 0x24a   :  { %v1071_v59 = vmul.f32 -1.442695, %v674_v56 }
 0x24b   :  { %v1070_v60 = vmul.f32 -1.442695, %v669_v58  ;;  %v1153_v61 = vpop.f32.mrb[4].mxu0 }
 0x24c   :  { %1230 = vpow2.f32 %v1071_v59  ;;  %v684_v62 = vadd.f32 %v1153_v61, %v1061_v54  ;;  %v678_v63 = vpop.f32.mrb[5].mxu0 }
 0x24d   :  { %1232 = vpow2.f32 %v1070_v60  ;;  %v679_v0 = vadd.f32 %v1061_v54, %v678_v63 }
 0x24e   :  { %v1073_v1 = vmul.f32 -1.442695, %v684_v62 }
 0x24f   :  { %v1072_v2 = vmul.f32 -1.442695, %v679_v0  ;;  %v1156_v3 = vpop.f32.mrb[8].mxu1 }
 0x250   :  { %1234 = vpow2.f32 %v1073_v1  ;;  %v694_v4 = vadd.f32 %v1156_v3, %v1061_v54  ;;  %v688_v5 = vpop.f32.mrb[9].mxu1  ;;  %v1266_v3 = vmov 0  }
 0x251   :  { %1236 = vpow2.f32 %v1072_v2  ;;  %v689_v7 = vadd.f32 %v1061_v54, %v688_v5  ;;  %1196 = vset.pattern.permute.xlu0 %v1266_v3  ;;  %1195 = vset.pattern.permute.xlu1 %v1266_v3 }
 0x252   :  { %v1075_v8 = vmul.f32 -1.442695, %v694_v4  ;;  %v810_v4 = vld [vmem:[%s1573_s2] sm:$0xff] }
 0x253   :  { %v1074_v9 = vmul.f32 -1.442695, %v689_v7  ;;  %v818_v5 = vrot.slane %v810_v4, %v1351_v16 }
 0x254   :  { %1238 = vpow2.f32 %v1075_v8 }
 0x255   :  { %1240 = vpow2.f32 %v1074_v9  ;;  %v1159_v10 = vpop.f32.mrb[10].mxu1  ;;  %v826_v7 = vcombine.high %v818_v5, %v818_v5  ;;  %v834_v9 = vrot.slane %v818_v5, %v1351_v16 }
 0x256   :  { %v1231_v11 = vpop.eup %1230  ;;  %v704_v13 = vadd.f32 %v1159_v10, %v1061_v54  ;;  %v698_v14 = vpop.f32.mrb[11].mxu1  ;;  %v811_v10 = vcombine.high %v810_v4, %v810_v4 }
 0x257   :  { %v1233_v19 = vpop.eup %1232  ;;  %v732_v20 = vadd.f32 1.0, %v1231_v11  ;;  %v699_v21 = vadd.f32 %v1061_v54, %v698_v14  ;;  %v848_v8 = vrot.slane %v826_v7, %v1351_v16 }
 0x258   :  { %v731_v22 = vadd.f32 1.0, %v1233_v19  ;;  %v1077_v24 = vmul.f32 -1.442695, %v704_v13  ;;  %v865_v13 = vrot.slane %v834_v9, %v1337_v12  ;;  %v1079_v19 = vld [vmem:[#allocation2] ss:$0 sm:$0xff] }
 0x259   :  { %1242 = vrcp.f32 %v732_v20  ;;  %v1076_v25 = vmul.f32 -1.442695, %v699_v21  ;;  %v869_v11 = vrot.slane %v848_v8, %v1337_v12  ;;  %v858_v14 = vcombine.high %v848_v8, %v848_v8 }
 0x25a   :  { %v1235_v26 = vpop.eup %1234  ;;  %1244 = vrcp.f32 %v731_v22  ;;  %v825_v20 = vrot.slane %v811_v10, %v1351_v16  ;;  %vm894_vm7 = vcmp.lt.s32.totalorder %v1328_v6, %v865_v13 }
 0x25b   :  { %v1237_v27 = vpop.eup %1236  ;;  %v734_v28 = vadd.f32 1.0, %v1235_v26  ;;  %1246 = vpow2.f32 %v1077_v24  ;;  %vm895_vm6 = vcmp.lt.s32.totalorder %v1328_v6, %v869_v11  ;;  %v856_v26 = vcombine.high %v834_v9, %v834_v9 }
 0x25c   :  { %v733_v29 = vadd.f32 1.0, %v1237_v27  ;;  %1248 = vpow2.f32 %v1076_v25  ;;  %v877_v25 = vrot.slane %v858_v14, %v1337_v12  ;;  %v827_v27 = vcombine.high %v825_v20, %v825_v20 }
 0x25d   :  { %1250 = vrcp.f32 %v734_v28 }
 0x25e   :  { %v1239_v30 = vpop.eup %1238  ;;  %1252 = vrcp.f32 %v733_v29  ;;  %vm897_vm8 = vcmp.lt.s32.totalorder %v1328_v6, %v877_v25 }
 0x25f   :  { %v1241_v31 = vpop.eup %1240  ;;  %v736_v32 = vadd.f32 1.0, %v1239_v30 }
 0x260   :  { %v735_v33 = vadd.f32 1.0, %v1241_v31 }
 0x261   :  { %1254 = vrcp.f32 %v736_v32  ;;  %v873_v32 = vrot.slane %v856_v26, %v1337_v12 }
 0x262   :  { %1256 = vrcp.f32 %v735_v33  ;;  %v855_v33 = vrot.slane %v827_v27, %v1351_v16 }
 0x263   :  { %v1243_v35 = vpop.eup %1242  ;;  %vm896_vm9 = vcmp.lt.s32.totalorder %v1328_v6, %v873_v32 }
 0x264   :  { %v1245_v36 = vpop.eup %1244  ;;  %v763_v37 = vmul.f32 %v1243_v35, %v1078_v34 }
 0x265   :  { %v1247_v39 = vpop.eup %1246  ;;  %v762_v40 = vmul.f32 %v1245_v36, %v1078_v34 }
 0x266   :  { %v1249_v42 = vpop.eup %1248  ;;  %v738_v43 = vadd.f32 1.0, %v1247_v39  ;;  %v774_v44 = vsel %vm770_vm5, %v763_v37, 0.0  ;;  %v885_v37 = vrot.slane %v855_v33, %v1337_v12  ;;  %v841_v39 = vrot.slane %v825_v20, %v1351_v16 }
 0x267   :  { %v1251_v45 = vpop.eup %1250  ;;  %v737_v46 = vadd.f32 1.0, %v1249_v42  ;;  %775 = vadd.xlane.f32.xlu1 %v774_v44  ;;  %v771_v47 = vsel %vm770_vm5, %v762_v40, 0.0  ;;  %v859_v16 = vcombine.high %v855_v33, %v855_v33 }
 0x268   :  { %v1253_v48 = vpop.eup %1252  ;;  %1258 = vrcp.f32 %v738_v43  ;;  %772 = vadd.xlane.f32.xlu0 %v771_v47  ;;  %v765_v51 = vmul.f32 %v1251_v45, %v1078_v34  ;;  %vm899_vm10 = vcmp.lt.s32.totalorder %v1328_v6, %v885_v37  ;;  %v881_v45 = vrot.slane %v841_v39, %v1337_v12 }
 0x269   :  { %1260 = vrcp.f32 %v737_v46  ;;  %v764_v54 = vmul.f32 %v1253_v48, %v1078_v34  ;;  %v857_v46 = vcombine.high %v841_v39, %v841_v39 }
 0x26a   :  { %v780_v52 = vsel %vm770_vm5, %v765_v51, 0.0  ;;  %vm898_vm11 = vcmp.lt.s32.totalorder %v1328_v6, %v881_v45 }
 0x26b   :  { %v1255_v53 = vpop.eup %1254  ;;  %v777_v58 = vsel %vm770_vm5, %v764_v54, 0.0 }
 0x26c   :  { %v1257_v55 = vpop.eup %1256  ;;  %781 = vadd.xlane.f32.xlu0 %v780_v52  ;;  %v767_v59 = vmul.f32 %v1255_v53, %v1078_v34  ;;  %v889_v53 = vrot.slane %v857_v46, %v1337_v12 }
 0x26d   :  { %v766_v56 = vmul.f32 %v1257_v55, %v1078_v34 }
 0x26e   :  { %v786_v62 = vsel %vm770_vm5, %v767_v59, 0.0  ;;  %vm900_vm12 = vcmp.lt.s32.totalorder %v1328_v6, %v889_v53 }
 0x26f   :  { %v783_v57 = vsel %vm770_vm5, %v766_v56, 0.0 }
 0x270   :  { %784 = vadd.xlane.f32.xlu1 %v783_v57  ;;  %778 = vadd.xlane.f32.xlu0 %v777_v58  ;;  %v893_v57 = vrot.slane %v859_v16, %v1337_v12 }
 0x272   :  { %v1259_v60 = vpop.eup %1258  ;;  %vm901_vm13 = vcmp.lt.s32.totalorder %v1328_v6, %v893_v57 }
 0x273   :  { %v1261_v61 = vpop.eup %1260  ;;  %v769_v63 = vmul.f32 %v1259_v60, %v1078_v34 }
 0x274   :  { %v768_v0 = vmul.f32 %v1261_v61, %v1078_v34  ;;  %787 = vadd.xlane.f32.xlu0 %v786_v62 }
 0x275   :  { %v792_v2 = vsel %vm770_vm5, %v769_v63, 0.0 }
 0x276   :  { %v789_v1 = vsel %vm770_vm5, %v768_v0, 0.0  ;;  %vm1034_vm5 = vcmask 1047559  }
 0x277   :  { %790 = vadd.xlane.f32.xlu1 %v789_v1 }
 0x278   :  { %793 = vadd.xlane.f32.xlu0 %v792_v2 }
 0x2f4   :  { %v776_v21 = vpop.xlane.xlu1 %775 }
 0x2f5   :  { %v803_v22 = vadd.f32 %v1079_v19, %v776_v21  ;;  %v773_v24 = vpop.xlane.xlu0 %772 }
 0x2f6   :  { %v802_v28 = vadd.f32 %v1079_v19, %v773_v24 }
 0x2f7   :  { %v903_v29 = vsel %vm895_vm6, 0.0, %v803_v22 }
 0x2f8   :  { %917 = vperm.xlu0 %1196, %v903_v29   ;;  %v902_v30 = vsel %vm894_vm7, 0.0, %v802_v28 }
 0x2f9   :  { %912 = vperm.xlu1 %1195, %v902_v30   ;;  %v782_v31 = vpop.xlane.xlu0 %781 }
 0x2fa   :  { %v805_v34 = vadd.f32 %v1079_v19, %v782_v31 }
 0x2fc   :  { %v905_v35 = vsel %vm897_vm8, 0.0, %v805_v34 }
 0x2fd   :  { %927 = vperm.xlu1 %1195, %v905_v35   ;;  %v779_v36 = vpop.xlane.xlu0 %778  ;;  %v785_v42 = vpop.xlane.xlu1 %784 }
 0x2fe   :  { %v804_v40 = vadd.f32 %v1079_v19, %v779_v36  ;;  %v806_v48 = vadd.f32 %v1079_v19, %v785_v42 }
 0x300   :  { %v904_v43 = vsel %vm896_vm9, 0.0, %v804_v40  ;;  %v906_v55 = vsel %vm898_vm11, 0.0, %v806_v48 }
 0x301   :  { %922 = vperm.xlu1 %1195, %v904_v43   ;;  %v788_v44 = vpop.xlane.xlu0 %787 }
 0x302   :  { %v807_v47 = vadd.f32 %v1079_v19, %v788_v44 }
 0x304   :  { %v907_v51 = vsel %vm899_vm10, 0.0, %v807_v47  ;;  %v791_v52 = vpop.xlane.xlu1 %790 }
 0x305   :  { %937 = vperm.xlu1 %1195, %v907_v51   ;;  %v808_v54 = vadd.f32 %v1079_v19, %v791_v52  ;;  %v794_v56 = vpop.xlane.xlu0 %793 }
 0x306   :  { %v809_v58 = vadd.f32 %v1079_v19, %v794_v56 }
 0x307   :  { %v908_v59 = vsel %vm900_vm12, 0.0, %v808_v54 }
 0x308   :  { %v909_v60 = vsel %vm901_vm13, 0.0, %v809_v58 }
 0x309   :  { %932 = vperm.xlu1 %1195, %v906_v55  }
 0x30d   :  { %942 = vperm.xlu1 %1195, %v908_v59  }
 0x311   :  { %947 = vperm.xlu1 %1195, %v909_v60  }
 0x377   :  { %v918_v61 = vpop.permute.xlu0 %917 }
 0x378   :  { %v951_v62 = vmul.f32 %v918_v61, %v1361_v18  ;;  %v913_v63 = vpop.permute.xlu1 %912 }
 0x379   :  { %v950_v0 = vmul.f32 %v913_v63, %v1348_v15 }
 0x37a   :  { %v965_v1 = vsel %vm118_vm2, %v951_v62, 0.0 }
 0x37b   :  { %v958_v2 = vsel %vm118_vm2, %v950_v0, 0.0  ;;  %v966_v4 = vrot.slane %v965_v1, 4 }
 0x37c   :  { %v928_v3 = vpop.permute.xlu1 %927  ;;  %v959_v5 = vrot.slane %v958_v2, 4 }
 0x37d   :  { %v953_v12 = vmul.f32 %v928_v3, %v1369_v23  ;;  %v967_v9 = vadd.f32 %v966_v4, %v965_v1 }
 0x37e   :  { %v960_v10 = vadd.f32 %v959_v5, %v958_v2 }
 0x37f   :  { %v979_v7 = vsel %vm118_vm2, %v953_v12, 0.0  ;;  %v968_v19 = vrot.slane %v967_v9, 2 }
 0x380   :  { %v923_v6 = vpop.permute.xlu1 %922  ;;  %v980_v18 = vrot.slane %v979_v7, 4  ;;  %v961_v20 = vrot.slane %v960_v10, 2 }
 0x381   :  { %v952_v8 = vmul.f32 %v923_v6, %v1356_v17  ;;  %v969_v27 = vadd.f32 %v968_v19, %v967_v9 }
 0x382   :  { %v981_v23 = vadd.f32 %v980_v18, %v979_v7  ;;  %v962_v28 = vadd.f32 %v961_v20, %v960_v10 }
 0x383   :  { %v972_v11 = vsel %vm118_vm2, %v952_v8, 0.0  ;;  %v970_v35 = vrot.slane %v969_v27, 1 }
 0x384   :  { %v973_v15 = vrot.slane %v972_v11, 4  ;;  %v938_v13 = vpop.permute.xlu1 %937  ;;  %v982_v29 = vrot.slane %v981_v23, 2  ;;  %v963_v36 = vrot.slane %v962_v28, 1 }
 0x385   :  { %v955_v14 = vmul.f32 %v938_v13, %v1401_v41  ;;  %v971_v47 = vadd.f32 %v970_v35, %v969_v27 }
 0x386   :  { %v974_v21 = vadd.f32 %v973_v15, %v972_v11  ;;  %v983_v39 = vadd.f32 %v982_v29, %v981_v23  ;;  %v964_v48 = vadd.f32 %v963_v36, %v962_v28 }
 0x387   :  { %v993_v22 = vsel %vm118_vm2, %v955_v14, 0.0 }
 0x388   :  { %v975_v24 = vrot.slane %v974_v21, 2  ;;  %v994_v25 = vrot.slane %v993_v22, 4  ;;  %v933_v26 = vpop.permute.xlu1 %932  ;;  %v984_v53 = vrot.slane %v983_v39, 1  ;;  %v1023_v58 = vsel %vm1022_vm14, %v971_v47, %v964_v48 }
 0x389   :  { %v954_v17 = vmul.f32 %v933_v26, %v1395_v38 }
 0x38a   :  { %v976_v30 = vadd.f32 %v975_v24, %v974_v21  ;;  %v995_v32 = vadd.f32 %v994_v25, %v993_v22  ;;  %v985_v62 = vadd.f32 %v984_v53, %v983_v39 }
 0x38b   :  { %v986_v31 = vsel %vm118_vm2, %v954_v17, 0.0 }
 0x38c   :  { %v987_v33 = vrot.slane %v986_v31, 4  ;;  %v943_v41 = vpop.permute.xlu1 %942  ;;  %v977_v40 = vrot.slane %v976_v30, 1  ;;  %v996_v43 = vrot.slane %v995_v32, 2 }
 0x38d   :  { %v956_v34 = vmul.f32 %v943_v41, %v1412_v49 }
 0x38e   :  { %v988_v37 = vadd.f32 %v987_v33, %v986_v31  ;;  %v978_v49 = vadd.f32 %v977_v40, %v976_v30  ;;  %v997_v54 = vadd.f32 %v996_v43, %v995_v32 }
 0x38f   :  { %v1000_v42 = vsel %vm118_vm2, %v956_v34, 0.0 }
 0x390   :  { %v989_v38 = vrot.slane %v988_v37, 2  ;;  %v1001_v44 = vrot.slane %v1000_v42, 4  ;;  %v948_v45 = vpop.permute.xlu1 %947  ;;  %v1025_v61 = vsel %vm1024_vm15, %v978_v49, %v1023_v58  ;;  %v998_v63 = vrot.slane %v997_v54, 1 }
 0x391   :  { %v957_v46 = vmul.f32 %v948_v45, %v1417_v50  ;;  %v1027_v2 = vsel %vm1026_vm0, %v985_v62, %v1025_v61 }
 0x392   :  { %v990_v51 = vadd.f32 %v989_v38, %v988_v37  ;;  %v1002_v52 = vadd.f32 %v1001_v44, %v1000_v42  ;;  %v999_v5 = vadd.f32 %v998_v63, %v997_v54 }
 0x393   :  { %v1007_v16 = vsel %vm118_vm2, %v957_v46, 0.0 }
 0x394   :  { %v991_v55 = vrot.slane %v990_v51, 1  ;;  %v1003_v56 = vrot.slane %v1002_v52, 2  ;;  %v1008_v57 = vrot.slane %v1007_v16, 4 }
 0x396   :  { %v1004_v59 = vadd.f32 %v1003_v56, %v1002_v52  ;;  %v1009_v60 = vadd.f32 %v1008_v57, %v1007_v16  ;;  %v992_v50 = vadd.f32 %v991_v55, %v990_v51 }
 0x398   :  { %v1005_v0 = vrot.slane %v1004_v59, 1  ;;  %v1010_v1 = vrot.slane %v1009_v60, 2  ;;  %v1029_v12 = vsel %vm1028_vm1, %v992_v50, %v1027_v2 }
 0x399   :  { %v1031_v6 = vsel %vm1030_vm3, %v999_v5, %v1029_v12 }
 0x39a   :  { %v1011_v3 = vadd.f32 %v1010_v1, %v1009_v60  ;;  %v1006_v4 = vadd.f32 %v1005_v0, %v1004_v59 }
 0x39c   :  { %v1012_v7 = vrot.slane %v1011_v3, 1  ;;  %v1033_v9 = vsel %vm1032_vm4, %v1006_v4, %v1031_v6 }
 0x39e   :  { %v1013_v8 = vadd.f32 %v1012_v7, %v1011_v3 }
 0x3a0   :  { %v1035_v10 = vsel %vm1034_vm5, %v1013_v8, %v1033_v9 }
 0x3a1   :  { %1037 = vst.msk [vmem:[%s1574_s10] sm:$0xff] %vm118_vm2, %v1035_v10 }

</bundles_post_ra>
